<compile_context>
chip_gen: v6e
topology: v6e:2x2x1
jax: 0.10.0
libtpu: 0.0.40
codegen_flags: <defaults>
</compile_context>

<pallas_src>
import functools
import math

import jax
import jax.numpy as jnp
import numpy as np
from jax.experimental import pallas as pl
from jax.experimental.pallas import tpu as pltpu


def _round_up(x, m):
    return ((x + m - 1) // m) * m


def _vmem_capacity_bytes():
    """Best-effort per-core VMEM capacity; conservative (v7x) fallback."""
    try:
        info = pltpu.get_tpu_info()
        cap = getattr(info, "vmem_capacity_bytes", None)
        if cap:
            return int(cap)
    except Exception:
        pass
    return 64 * 1024 * 1024


def _pow_int(x, n):
    """x**n for integer n >= 1 via exponentiation-by-squaring (VPU mults only)."""
    result = None
    base = x
    while n > 0:
        if n & 1:
            result = base if result is None else result * base
        n >>= 1
        if n:
            base = base * base
    return result


def _minerva2_kernel(f_ref, ex_ref, rnorm_ref, cls_ref, out_ref, acc_ref, *,
                     p_int, p_float, d_valid, tdk, needs_mask):
    """normalize(probes) -> cosine sim -> signed power -> echo+intensity."""
    k = pl.program_id(1)
    nk = pl.num_programs(1)

    @pl.when(k == 0)
    def _():
        acc_ref[...] = jnp.zeros_like(acc_ref)

    # Row-wise L2 normalization of the probe tile: x / max(||x||, 1e-12).
    f = f_ref[...].astype(jnp.float32)
    ssq = jnp.sum(f * f, axis=1, keepdims=True)
    f_norm = f * jax.lax.rsqrt(jnp.maximum(ssq, jnp.float32(1e-24)))

    mm_dtype = ex_ref.dtype
    # Cosine similarity vs the raw exemplar chunk; contract H on BOTH operands
    # (no transpose).  Exemplar normalization is a per-column scale after the
    # dot (rnorm = 1 / max(||ex||, eps); 0 for zero-padded rows).
    s = jax.lax.dot_general(
        f_norm.astype(mm_dtype), ex_ref[...],
        dimension_numbers=(((1,), (1,)), ((), ())),
        preferred_element_type=jnp.float32)
    s = s * rnorm_ref[...]                                   # (1, TDk) bcast

    # Signed-power activation |s|^p * sign(s).
    if p_int is not None:
        if p_int == 1:
            a = s
        else:
            a = _pow_int(s, p_int)
            if p_int % 2 == 0:           # even power loses the sign: re-apply
                a = a * jnp.sign(s)
    elif p_float > 0.0:
        ip = int(math.floor(p_float))
        frac = p_float - ip
        abs_s = jnp.abs(s)
        if abs(frac - 0.5) < 1e-9:
            fm = jnp.sqrt(abs_s)         # one EUP sqrt instead of log+exp
        else:
            fm = jnp.power(abs_s, jnp.float32(frac))
        mag = fm if ip == 0 else _pow_int(abs_s, ip) * fm
        a = mag * jnp.sign(s)
    else:
        a = jnp.power(jnp.abs(s), jnp.float32(p_float)) * jnp.sign(s)

    if needs_mask:
        # p <= 0 would turn zero-padded exemplar columns into inf/nan.
        col = k * tdk + jax.lax.broadcasted_iota(jnp.int32, s.shape, 1)
        a = jnp.where(col < d_valid, a, jnp.float32(0.0))

    # Echo + intensity with one MXU dot: cls has a ones column at column C,
    # so acc[:, C] accumulates the row-sum of `a` (the intensity).
    acc_ref[...] += jnp.dot(a.astype(mm_dtype), cls_ref[...],
                            preferred_element_type=jnp.float32)

    @pl.when(k == nk - 1)
    def _():
        out_ref[...] = acc_ref[...].astype(out_ref.dtype)


def minerva2_forward(features, ex_features, ex_class_reps, p_factor=1,
                     block_n=None, use_bf16=True):
    """Pallas implementation of minerva2.forward -> (echo (N,C), intensity (N,))."""
    N, H = features.shape
    D, H2 = ex_features.shape
    assert H == H2
    D2, C = ex_class_reps.shape
    assert D == D2

    out_dtype = features.dtype
    f32 = jnp.float32
    mm_dtype = jnp.bfloat16 if use_bf16 else jnp.float32
    mm_bytes = 2 if use_bf16 else 4

    cap = _vmem_capacity_bytes()
    big_vmem = cap >= 100 * 1024 * 1024        # v5e/v6e: 128 MiB; v7x: 64 MiB/TC
    vmem_limit = max(32 << 20, min(cap - (8 << 20), int(cap * 0.8)))

    Hp = _round_up(H, 128)
    Cp = _round_up(C + 1, 128)       # +1 column carries the intensity row-sum

    # Probe-row tile: larger on 128-MiB chips, smaller on v7x.
    if block_n is None:
        block_n = 512 if big_vmem else 256
    TN = min(_round_up(block_n, 8), _round_up(N, 8))
    f_tile_budget = (24 << 20) if big_vmem else (12 << 20)
    while TN > 64 and TN * Hp * 4 * 2 > f_tile_budget:
        TN //= 2
    TN = max(8, _round_up(TN, 8))
    Np = _round_up(N, TN)

    # Exemplar chunk (D-reduction tile): keep the exemplar block and the
    # (TN, TDk) f32 temporaries inside the VMEM budget.
    Dp_min = _round_up(D, 128)
    ex_budget = (40 << 20) if big_vmem else (16 << 20)
    tmp_budget = (12 << 20) if big_vmem else (6 << 20)
    hard_cap = 4096 if big_vmem else 2048
    cap_ex = max(128, (ex_budget // (Hp * mm_bytes)) // 128 * 128)
    cap_tmp = max(128, (tmp_budget // (TN * 8)) // 128 * 128)
    TDk = min(Dp_min, cap_ex, cap_tmp, hard_cap)
    Dp = _round_up(D, TDk)
    nd = Dp // TDk
    # TODO(synk): very large H is kept as one resident block; an H-reduction
    # axis would be the next step for H*mm_bytes chunks beyond the VMEM budget.

    # ---- Wrapper-side prep (skip the zero-pad pass when already aligned). ----
    def _prep(x, rows, cols, dtype):
        r0, c0 = x.shape
        if (r0, c0) == (rows, cols):
            return x.astype(dtype)
        return jnp.zeros((rows, cols), dtype).at[:r0, :c0].set(x.astype(dtype))

    f_in = features if (N == Np and H == Hp) else _prep(features, Np, Hp, f32)
    ex_in = _prep(ex_features, Dp, Hp, mm_dtype)

    cls_in = jnp.zeros((Dp, Cp), mm_dtype)
    cls_in = cls_in.at[:D, :C].set(ex_class_reps.astype(mm_dtype))
    cls_in = cls_in.at[:D, C].set(1.0)        # ones column -> intensity on MXU

    # Per-exemplar reciprocal norm 1/max(||ex||, 1e-12); padded rows get 0.
    ex_f32 = ex_features.astype(f32)
    rnorm = jax.lax.rsqrt(jnp.maximum(jnp.sum(ex_f32 * ex_f32, axis=1),
                                      jnp.float32(1e-24)))
    rnorm_in = jnp.zeros((1, Dp), f32).at[0, :D].set(rnorm)

    p = float(p_factor)
    p_round = round(p)
    p_int = int(p_round) if (abs(p - p_round) < 1e-9 and 1 <= p_round <= 64) else None
    needs_mask = (D < Dp) and (p <= 0.0)

    kernel = functools.partial(_minerva2_kernel, p_int=p_int, p_float=p,
                               d_valid=D, tdk=TDk, needs_mask=needs_mask)

    def _call(single_buffer_residents):
        def _res_spec(shape, imap):
            # Constant-index resident blocks never re-DMA: single-buffer them.
            if single_buffer_residents:
                return pl.BlockSpec(shape, imap, pipeline_mode=pl.Buffered(1))
            return pl.BlockSpec(shape, imap)

        return pl.pallas_call(
            kernel,
            out_shape=jax.ShapeDtypeStruct((Np, Cp), out_dtype),
            grid=(Np // TN, nd),
            in_specs=[
                pl.BlockSpec((TN, Hp), lambda i, k: (i, 0)),   # probe tile
                _res_spec((TDk, Hp), lambda i, k: (k, 0)),     # exemplar chunk
                _res_spec((1, TDk), lambda i, k: (0, k)),      # 1/||ex|| chunk
                _res_spec((TDk, Cp), lambda i, k: (k, 0)),     # class reps+ones
            ],
            out_specs=pl.BlockSpec((TN, Cp), lambda i, k: (i, 0)),
            scratch_shapes=[pltpu.VMEM((TN, Cp), jnp.float32)],
            compiler_params=pltpu.CompilerParams(
                # On v7x, pltpu.CORE_PARALLEL on axis 0 could shard the N tiles
                # across both TensorCores; kept generation-agnostic here.
                dimension_semantics=("parallel", "arbitrary"),
                vmem_limit_bytes=int(vmem_limit)),
        )(f_in, ex_in, rnorm_in, cls_in)

    try:
        out = _call(nd == 1)
    except Exception:
        # Fallback in case pipeline_mode=pl.Buffered(1) is not supported.
        out = _call(False)

    echo = out[:N, :C]
    intensity = out[:N, C]
    return echo, intensity


def _reference_forward(features, ex_features, ex_class_reps, p_factor=1):
    """Pure-JAX reference mirroring the PyTorch module (for validation)."""
    eps = 1e-12
    fn = features / jnp.maximum(
        jnp.linalg.norm(features, axis=1, keepdims=True), eps)
    en = ex_features / jnp.maximum(
        jnp.linalg.norm(ex_features, axis=1, keepdims=True), eps)
    s = fn @ en.T
    a = jnp.power(jnp.abs(s), float(p_factor)) * jnp.sign(s)
    return a @ ex_class_reps, a.sum(axis=1)


if __name__ == "__main__":
    # Small shapes consistent with the module's docstring example.
    N, H, D, C = 8, 32, 16, 4

    key = jax.random.PRNGKey(0)
    k1, k2, k3 = jax.random.split(key, 3)
    features = jax.random.normal(k1, (N, H), dtype=jnp.float32)
    ex_features = jax.random.normal(k2, (D, H), dtype=jnp.float32)
    ex_class_reps = jax.random.normal(k3, (D, C), dtype=jnp.float32)

    # f32-MXU path: tight check of the algorithm (integer p).
    echo, intensity = minerva2_forward(features, ex_features, ex_class_reps,
                                       p_factor=3, use_bf16=False)
    jax.block_until_ready((echo, intensity))
    echo_ref, inten_ref = _reference_forward(features, ex_features,
                                             ex_class_reps, p_factor=3)
    assert echo.shape == (N, C) and intensity.shape == (N,)
    np.testing.assert_allclose(np.asarray(echo), np.asarray(echo_ref),
                               rtol=1e-4, atol=1e-4)
    np.testing.assert_allclose(np.asarray(intensity), np.asarray(inten_ref),
                               rtol=1e-4, atol=1e-4)

    # Non-integer p exercises the sqrt-decomposed fractional-power path (f32).
    echo2, inten2 = minerva2_forward(features, ex_features, ex_class_reps,
                                     p_factor=2.5, use_bf16=False)
    jax.block_until_ready((echo2, inten2))
    echo2_ref, inten2_ref = _reference_forward(features, ex_features,
                                               ex_class_reps, p_factor=2.5)
    np.testing.assert_allclose(np.asarray(echo2), np.asarray(echo2_ref),
                               rtol=1e-4, atol=1e-4)
    np.testing.assert_allclose(np.asarray(inten2), np.asarray(inten2_ref),
                               rtol=1e-4, atol=1e-4)

    # Default bf16-MXU path (f32 accumulation): deliberately loosened tolerance.
    echo3, inten3 = minerva2_forward(features, ex_features, ex_class_reps,
                                     p_factor=3)
    jax.block_until_ready((echo3, inten3))
    np.testing.assert_allclose(np.asarray(echo3), np.asarray(echo_ref),
                               rtol=2e-2, atol=2e-2)
    np.testing.assert_allclose(np.asarray(inten3), np.asarray(inten_ref),
                               rtol=2e-2, atol=2e-2)

    print("KERNEL_OK")
</pallas_src>

<mosaic_0001>
module attributes {stable_mosaic.version = 11 : i64} {
  func.func @_minerva2_kernel(%arg0: i32, %arg1: i32, %arg2: memref<8x128xf32, #tpu.memory_space<vmem>>, %arg3: memref<128x128xf32, #tpu.memory_space<vmem>>, %arg4: memref<1x128xf32, #tpu.memory_space<vmem>>, %arg5: memref<128x128xf32, #tpu.memory_space<vmem>>, %arg6: memref<8x128xf32, #tpu.memory_space<vmem>>, %arg7: memref<8x128xf32, #tpu.memory_space<vmem>>) attributes {dimension_semantics = [#tpu.dimension_semantics<parallel>, #tpu.dimension_semantics<arbitrary>], iteration_bounds = array<i64: 1, 1>, scalar_prefetch = 0 : i64, scratch_operands = 1 : i64, tpu.core_type = #tpu.core_type<tc>, window_params = [{transform_indices = @transform_0, window_bounds = array<i64: 8, 128>}, {pipeline_mode = #tpu.pipeline_mode<synchronous>, transform_indices = @transform_1, window_bounds = array<i64: 128, 128>}, {pipeline_mode = #tpu.pipeline_mode<synchronous>, transform_indices = @transform_2, window_bounds = array<i64: 1, 128>}, {pipeline_mode = #tpu.pipeline_mode<synchronous>, transform_indices = @transform_3, window_bounds = array<i64: 128, 128>}, {transform_indices = @transform_4, window_bounds = array<i64: 8, 128>}]} {
    %c0_i32 = arith.constant 0 : i32
    %0 = arith.cmpi eq, %arg1, %c0_i32 : i32
    %1 = arith.extui %0 : i1 to i32
    %c0_i32_0 = arith.constant 0 : i32
    %2 = arith.cmpi ne, %1, %c0_i32_0 : i32
    scf.if %2 {
      %cst_17 = arith.constant 0.000000e+00 : f32
      %27 = vector.broadcast %cst_17 : f32 to vector<8x128xf32>
      %c0_18 = arith.constant 0 : index
      %c0_19 = arith.constant 0 : index
      %28 = vector.load %arg7[%c0_18, %c0_19] : memref<8x128xf32, #tpu.memory_space<vmem>>, vector<8x128xf32>
      tpu.vector_store %arg7[%c0_18, %c0_19], %27 {strides = array<i32>} : memref<8x128xf32, #tpu.memory_space<vmem>>, vector<8x128xf32>,
    } else {
    }
    %c0 = arith.constant 0 : index
    %c0_1 = arith.constant 0 : index
    %3 = vector.load %arg2[%c0, %c0_1] : memref<8x128xf32, #tpu.memory_space<vmem>>, vector<8x128xf32>
    %4 = arith.mulf %3, %3 : vector<8x128xf32>
    %cst = arith.constant dense<0.000000e+00> : vector<8xf32>
    %5 = vector.multi_reduction <add>, %4, %cst [1] : vector<8x128xf32> to vector<8xf32>
    %6 = vector.shape_cast %5 : vector<8xf32> to vector<8x1xf32>
    %cst_2 = arith.constant 1.000000e-24 : f32
    %7 = vector.broadcast %cst_2 : f32 to vector<8x1xf32>
    %8 = arith.maximumf %6, %7 : vector<8x1xf32>
    %9 = math.rsqrt %8 : vector<8x1xf32>
    %10 = vector.broadcast %9 : vector<8x1xf32> to vector<8x128xf32>
    %11 = arith.mulf %3, %10 : vector<8x128xf32>
    %c0_3 = arith.constant 0 : index
    %c0_4 = arith.constant 0 : index
    %12 = vector.load %arg3[%c0_3, %c0_4] : memref<128x128xf32, #tpu.memory_space<vmem>>, vector<128x128xf32>
    %cst_5 = arith.constant dense<0.000000e+00> : vector<8x128xf32>
    %13 = tpu.matmul %11, %12, %cst_5 {dimension_numbers = #tpu.dot_dimension_numbers<[1], [1], [0], [0], [0, 0, 1, 0], [], []>} : vector<8x128xf32>, vector<128x128xf32>, vector<8x128xf32> -> vector<8x128xf32>
    %c0_6 = arith.constant 0 : index
    %c0_7 = arith.constant 0 : index
    %14 = vector.load %arg4[%c0_6, %c0_7] : memref<1x128xf32, #tpu.memory_space<vmem>>, vector<1x128xf32>
    %15 = vector.broadcast %14 : vector<1x128xf32> to vector<8x128xf32>
    %16 = arith.mulf %13, %15 : vector<8x128xf32>
    %17 = arith.mulf %16, %16 : vector<8x128xf32>
    %18 = arith.mulf %16, %17 : vector<8x128xf32>
    %c0_8 = arith.constant 0 : index
    %c0_9 = arith.constant 0 : index
    %19 = vector.load %arg7[%c0_8, %c0_9] : memref<8x128xf32, #tpu.memory_space<vmem>>, vector<8x128xf32>
    %c0_10 = arith.constant 0 : index
    %c0_11 = arith.constant 0 : index
    %20 = vector.load %arg5[%c0_10, %c0_11] : memref<128x128xf32, #tpu.memory_space<vmem>>, vector<128x128xf32>
    %cst_12 = arith.constant dense<0.000000e+00> : vector<8x128xf32>
    %21 = tpu.matmul %18, %20, %cst_12 {dimension_numbers = #tpu.dot_dimension_numbers<[1], [0], [0], [1], [0, 0, 1, 1], [], []>} : vector<8x128xf32>, vector<128x128xf32>, vector<8x128xf32> -> vector<8x128xf32>
    %22 = arith.addf %19, %21 : vector<8x128xf32>
    %c0_13 = arith.constant 0 : index
    %c0_14 = arith.constant 0 : index
    %23 = vector.load %arg7[%c0_13, %c0_14] : memref<8x128xf32, #tpu.memory_space<vmem>>, vector<8x128xf32>
    tpu.vector_store %arg7[%c0_13, %c0_14], %22 {strides = array<i32>} : memref<8x128xf32, #tpu.memory_space<vmem>>, vector<8x128xf32>,
    %c0_i32_15 = arith.constant 0 : i32
    %24 = arith.cmpi eq, %arg1, %c0_i32_15 : i32
    %25 = arith.extui %24 : i1 to i32
    %c0_i32_16 = arith.constant 0 : i32
    %26 = arith.cmpi ne, %25, %c0_i32_16 : i32
    scf.if %26 {
      %c0_17 = arith.constant 0 : index
      %c0_18 = arith.constant 0 : index
      %27 = vector.load %arg7[%c0_17, %c0_18] : memref<8x128xf32, #tpu.memory_space<vmem>>, vector<8x128xf32>
      %c0_19 = arith.constant 0 : index
      %c0_20 = arith.constant 0 : index
      %28 = vector.load %arg6[%c0_19, %c0_20] : memref<8x128xf32, #tpu.memory_space<vmem>>, vector<8x128xf32>
      tpu.vector_store %arg6[%c0_19, %c0_20], %27 {strides = array<i32>} : memref<8x128xf32, #tpu.memory_space<vmem>>, vector<8x128xf32>,
    } else {
    }
    return
  }
  func.func @transform_0(%arg0: i32, %arg1: i32) -> (i32, i32) {
    %c0_i32 = arith.constant 0 : i32
    %c0_i32_0 = arith.constant 0 : i32
    return %arg0, %c0_i32 : i32, i32
  }
  func.func @transform_1(%arg0: i32, %arg1: i32) -> (i32, i32) {
    %c0_i32 = arith.constant 0 : i32
    %c0_i32_0 = arith.constant 0 : i32
    return %arg1, %c0_i32 : i32, i32
  }
  func.func @transform_2(%arg0: i32, %arg1: i32) -> (i32, i32) {
    %c0_i32 = arith.constant 0 : i32
    %c0_i32_0 = arith.constant 0 : i32
    return %c0_i32, %arg1 : i32, i32
  }
  func.func @transform_3(%arg0: i32, %arg1: i32) -> (i32, i32) {
    %c0_i32 = arith.constant 0 : i32
    %c0_i32_0 = arith.constant 0 : i32
    return %arg1, %c0_i32 : i32, i32
  }
  func.func @transform_4(%arg0: i32, %arg1: i32) -> (i32, i32) {
    %c0_i32 = arith.constant 0 : i32
    %c0_i32_0 = arith.constant 0 : i32
    return %arg0, %c0_i32 : i32, i32
  }
}

module attributes {stable_mosaic.version = 11 : i64} {
  func.func @_minerva2_kernel(%arg0: i32, %arg1: i32, %arg2: memref<8x128xf32, #tpu.memory_space<vmem>>, %arg3: memref<128x128xf32, #tpu.memory_space<vmem>>, %arg4: memref<1x128xf32, #tpu.memory_space<vmem>>, %arg5: memref<128x128xf32, #tpu.memory_space<vmem>>, %arg6: memref<8x128xf32, #tpu.memory_space<vmem>>, %arg7: memref<8x128xf32, #tpu.memory_space<vmem>>) attributes {dimension_semantics = [#tpu.dimension_semantics<parallel>, #tpu.dimension_semantics<arbitrary>], iteration_bounds = array<i64: 1, 1>, scalar_prefetch = 0 : i64, scratch_operands = 1 : i64, tpu.core_type = #tpu.core_type<tc>, window_params = [{transform_indices = @transform_0, window_bounds = array<i64: 8, 128>}, {transform_indices = @transform_1, window_bounds = array<i64: 128, 128>}, {transform_indices = @transform_2, window_bounds = array<i64: 1, 128>}, {transform_indices = @transform_3, window_bounds = array<i64: 128, 128>}, {transform_indices = @transform_4, window_bounds = array<i64: 8, 128>}]} {
    %c0_i32 = arith.constant 0 : i32
    %0 = arith.cmpi eq, %arg1, %c0_i32 : i32
    %1 = arith.extui %0 : i1 to i32
    %c0_i32_0 = arith.constant 0 : i32
    %2 = arith.cmpi ne, %1, %c0_i32_0 : i32
    scf.if %2 {
      %cst_17 = arith.constant 0.000000e+00 : f32
      %27 = vector.broadcast %cst_17 : f32 to vector<8x128xf32>
      %c0_18 = arith.constant 0 : index
      %c0_19 = arith.constant 0 : index
      %28 = vector.load %arg7[%c0_18, %c0_19] : memref<8x128xf32, #tpu.memory_space<vmem>>, vector<8x128xf32>
      tpu.vector_store %arg7[%c0_18, %c0_19], %27 {strides = array<i32>} : memref<8x128xf32, #tpu.memory_space<vmem>>, vector<8x128xf32>,
    } else {
    }
    %c0 = arith.constant 0 : index
    %c0_1 = arith.constant 0 : index
    %3 = vector.load %arg2[%c0, %c0_1] : memref<8x128xf32, #tpu.memory_space<vmem>>, vector<8x128xf32>
    %4 = arith.mulf %3, %3 : vector<8x128xf32>
    %cst = arith.constant dense<0.000000e+00> : vector<8xf32>
    %5 = vector.multi_reduction <add>, %4, %cst [1] : vector<8x128xf32> to vector<8xf32>
    %6 = vector.shape_cast %5 : vector<8xf32> to vector<8x1xf32>
    %cst_2 = arith.constant 1.000000e-24 : f32
    %7 = vector.broadcast %cst_2 : f32 to vector<8x1xf32>
    %8 = arith.maximumf %6, %7 : vector<8x1xf32>
    %9 = math.rsqrt %8 : vector<8x1xf32>
    %10 = vector.broadcast %9 : vector<8x1xf32> to vector<8x128xf32>
    %11 = arith.mulf %3, %10 : vector<8x128xf32>
    %c0_3 = arith.constant 0 : index
    %c0_4 = arith.constant 0 : index
    %12 = vector.load %arg3[%c0_3, %c0_4] : memref<128x128xf32, #tpu.memory_space<vmem>>, vector<128x128xf32>
    %cst_5 = arith.constant dense<0.000000e+00> : vector<8x128xf32>
    %13 = tpu.matmul %11, %12, %cst_5 {dimension_numbers = #tpu.dot_dimension_numbers<[1], [1], [0], [0], [0, 0, 1, 0], [], []>} : vector<8x128xf32>, vector<128x128xf32>, vector<8x128xf32> -> vector<8x128xf32>
    %c0_6 = arith.constant 0 : index
    %c0_7 = arith.constant 0 : index
    %14 = vector.load %arg4[%c0_6, %c0_7] : memref<1x128xf32, #tpu.memory_space<vmem>>, vector<1x128xf32>
    %15 = vector.broadcast %14 : vector<1x128xf32> to vector<8x128xf32>
    %16 = arith.mulf %13, %15 : vector<8x128xf32>
    %17 = arith.mulf %16, %16 : vector<8x128xf32>
    %18 = arith.mulf %16, %17 : vector<8x128xf32>
    %c0_8 = arith.constant 0 : index
    %c0_9 = arith.constant 0 : index
    %19 = vector.load %arg7[%c0_8, %c0_9] : memref<8x128xf32, #tpu.memory_space<vmem>>, vector<8x128xf32>
    %c0_10 = arith.constant 0 : index
    %c0_11 = arith.constant 0 : index
    %20 = vector.load %arg5[%c0_10, %c0_11] : memref<128x128xf32, #tpu.memory_space<vmem>>, vector<128x128xf32>
    %cst_12 = arith.constant dense<0.000000e+00> : vector<8x128xf32>
    %21 = tpu.matmul %18, %20, %cst_12 {dimension_numbers = #tpu.dot_dimension_numbers<[1], [0], [0], [1], [0, 0, 1, 1], [], []>} : vector<8x128xf32>, vector<128x128xf32>, vector<8x128xf32> -> vector<8x128xf32>
    %22 = arith.addf %19, %21 : vector<8x128xf32>
    %c0_13 = arith.constant 0 : index
    %c0_14 = arith.constant 0 : index
    %23 = vector.load %arg7[%c0_13, %c0_14] : memref<8x128xf32, #tpu.memory_space<vmem>>, vector<8x128xf32>
    tpu.vector_store %arg7[%c0_13, %c0_14], %22 {strides = array<i32>} : memref<8x128xf32, #tpu.memory_space<vmem>>, vector<8x128xf32>,
    %c0_i32_15 = arith.constant 0 : i32
    %24 = arith.cmpi eq, %arg1, %c0_i32_15 : i32
    %25 = arith.extui %24 : i1 to i32
    %c0_i32_16 = arith.constant 0 : i32
    %26 = arith.cmpi ne, %25, %c0_i32_16 : i32
    scf.if %26 {
      %c0_17 = arith.constant 0 : index
      %c0_18 = arith.constant 0 : index
      %27 = vector.load %arg7[%c0_17, %c0_18] : memref<8x128xf32, #tpu.memory_space<vmem>>, vector<8x128xf32>
      %c0_19 = arith.constant 0 : index
      %c0_20 = arith.constant 0 : index
      %28 = vector.load %arg6[%c0_19, %c0_20] : memref<8x128xf32, #tpu.memory_space<vmem>>, vector<8x128xf32>
      tpu.vector_store %arg6[%c0_19, %c0_20], %27 {strides = array<i32>} : memref<8x128xf32, #tpu.memory_space<vmem>>, vector<8x128xf32>,
    } else {
    }
    return
  }
  func.func @transform_0(%arg0: i32, %arg1: i32) -> (i32, i32) {
    %c0_i32 = arith.constant 0 : i32
    %c0_i32_0 = arith.constant 0 : i32
    return %arg0, %c0_i32 : i32, i32
  }
  func.func @transform_1(%arg0: i32, %arg1: i32) -> (i32, i32) {
    %c0_i32 = arith.constant 0 : i32
    %c0_i32_0 = arith.constant 0 : i32
    return %arg1, %c0_i32 : i32, i32
  }
  func.func @transform_2(%arg0: i32, %arg1: i32) -> (i32, i32) {
    %c0_i32 = arith.constant 0 : i32
    %c0_i32_0 = arith.constant 0 : i32
    return %c0_i32, %arg1 : i32, i32
  }
  func.func @transform_3(%arg0: i32, %arg1: i32) -> (i32, i32) {
    %c0_i32 = arith.constant 0 : i32
    %c0_i32_0 = arith.constant 0 : i32
    return %arg1, %c0_i32 : i32, i32
  }
  func.func @transform_4(%arg0: i32, %arg1: i32) -> (i32, i32) {
    %c0_i32 = arith.constant 0 : i32
    %c0_i32_0 = arith.constant 0 : i32
    return %arg0, %c0_i32 : i32, i32
  }
}

</mosaic_0001>

<bundles_post_ra>
// kernel: tpu_custom_call.1
= control target key start
LH: loop header
LB: loop body
LE: loop exit
PB: predicated region body
PF: predicated region fallthrough
CT: control target
= control target key end

     0   :  { %9 = vsyncpa [#allocation4], 0  ;;  %s563_s0 = inlined_call_operand.hbm [shape: f32[8,128], index: 0, kind: input, shape index: {}]   ;;  %s564_s1 = inlined_call_operand.hbm [shape: f32[128,128], index: 1, kind: input, shape index: {}]   ;;  %s565_s2 = inlined_call_operand.vmem [shape: f32[1,128], index: 2, kind: input, shape index: {}]   ;;  %s566_s3 = inlined_call_operand.hbm [shape: f32[128,128], index: 3, kind: input, shape index: {}]   ;;  %s567_s4 = inlined_call_operand.hbm [shape: f32[8,128], index: 4, kind: output, shape index: {}]  }
   0x1   :  { %10 = vsyncpa [#allocation7], 0 }
   0x2   :  { %11 = vsyncpa [#allocation5], 0  ;;  %s476_s15 = smov [#allocation6]  }
   0x3   :  { %s27_s16 = sshll.u32 %s476_s15, 4  ;;  %s28_s16 = int_to_ptr.vmem [resolvable:$true] %s27_s16 }
   0x4   :  { %s398_s17 = scalar_lea.vmem %s28_s16, 2048  ;;  %p403_p1 = scmp.lt.s32.totalorder %s28_s16, %s28_s16 }
   0x5   :  { %p399_p0 = scmp.ne.s32.totalorder %s28_s16, %s398_s17  ;;  %p404_p2 = scmp.lt.s32.totalorder %s398_s17, %s398_s17 }
   0x7   :  { %p405_p3 = por %p404_p2, %p403_p1 }
   0x9   :  { %p406_p4 = pnand %p405_p3, %p399_p0 }
   0xb   :  { %409 = shalt.err (!%p406_p4)
}
   0xc   :  { %s477_s18 = smov 128   ;;  %s478_s19 = smov 8  }
   0xd   :  { %33 = dma.hbm_to_vmem [thread:$0]  %s564_s1, 2048, %s28_s16, [#allocation7], %s477_s18, %s477_s18, %s478_s19  }
   0xe   :  { %s479_s22 = smov [#allocation3]   ;;  %s480_s24 = smov [#allocation8]  }
   0xf   :  { %s18_s23 = sshll.u32 %s479_s22, 4  ;;  %s41_s25 = sshll.u32 %s480_s24, 4  ;;  %s19_s23 = int_to_ptr.vmem [resolvable:$true] %s18_s23  ;;  %s42_s25 = int_to_ptr.vmem [resolvable:$true] %s41_s25 }
  0x10   :  { %s418_s26 = scalar_lea.vmem %s19_s23, 128  ;;  %p423_p6 = scmp.lt.s32.totalorder %s19_s23, %s19_s23 }
  0x11   :  { %p419_p5 = scmp.ne.s32.totalorder %s19_s23, %s418_s26  ;;  %p424_p7 = scmp.lt.s32.totalorder %s418_s26, %s418_s26 }
  0x13   :  { %p425_p8 = por %p424_p7, %p423_p6 }
  0x15   :  { %p426_p9 = pnand %p425_p8, %p419_p5 }
  0x17   :  { %429 = shalt.err (!%p426_p9)
}
  0x18   :  { %21 = dma.hbm_to_vmem [thread:$0]  %s563_s0, 128, %s19_s23, [#allocation4]  }
  0x19   :  { %s438_s29 = scalar_lea.vmem %s42_s25, 2048  ;;  %p443_p11 = scmp.lt.s32.totalorder %s42_s25, %s42_s25 }
  0x1a   :  { %p439_p10 = scmp.ne.s32.totalorder %s42_s25, %s438_s29  ;;  %p444_p12 = scmp.lt.s32.totalorder %s438_s29, %s438_s29 }
  0x1c   :  { %p445_p13 = por %p444_p12, %p443_p11 }
  0x1e   :  { %p446_p0 = pnand %p445_p13, %p439_p10 }
  0x20   :  { %449 = shalt.err (!%p446_p0)
}
  0x21   :  { %47 = dma.hbm_to_vmem [thread:$0]  %s566_s3, 2048, %s42_s25, [#allocation7], %s477_s18, %s477_s18, %s478_s19  }
  0x22   :  { %470 = dma.done.wait [#allocation4], 128  }
  0x23   :  { %471 = vsyncadd [#allocation4], 4294967168 }
  0x24   :  { %472 = dma.done.wait [#allocation7], 4096  }
  0x25   :  { %473 = vsyncadd [#allocation7], 4294963200  ;;  %v481_v0 = vmov 0.0   ;;  %v520_v1 = vld [vmem:[#allocation3] sm:$0xff]  ;;  %v83_v4 = vld [vmem:[#allocation6 + $0x70] sm:$0xff]  ;;  %vm482_vm0 = vmmov 0  }
  0x26   :  { %310 = vmatprep.subr.mxu0 %v481_v0  ;;  %345 = vmatprep.subr.mxu1 %v481_v0  ;;  %v84_v2 = vld [vmem:[#allocation6 + $0x78] sm:$0xff]  ;;  %v63_v3 = vmul.f32 %v520_v1, %v520_v1  ;;  %v82_v5 = vld [vmem:[#allocation6 + $0x68] sm:$0xff]  ;;  %v81_v6 = vld [vmem:[#allocation6 + $0x60] sm:$0xff]  ;;  %s483_s5 = smov [#allocation9]  }
  0x27   :  { %311 = vmatpush3.xpose.msra.mxu0 %v84_v2  ;;  %v80_v7 = vld [vmem:[#allocation6 + $0x58] sm:$0xff]  ;;  %342 = vmatprep.mubr.msk.f32.mxu0 %vm482_vm0, %v481_v0  ;;  %v79_v8 = vld [vmem:[#allocation6 + $0x50] sm:$0xff]  ;;  %v78_v9 = vld [vmem:[#allocation6 + $0x48] sm:$0xff]  ;;  %s265_s6 = sshll.u32 %s483_s5, 4  ;;  %s266_s6 = int_to_ptr.vmem [resolvable:$true] %s265_s6 }
  0x28   :  { %312 = vmatprep.subr.mxu0 %v481_v0  ;;  %64 = vadd.xlane.f32.xlu0 %v63_v3  ;;  %v77_v10 = vld [vmem:[#allocation6 + $0x40] sm:$0xff]  ;;  %v76_v11 = vld [vmem:[#allocation6 + $0x38] sm:$0xff]  ;;  %v180_v13 = vld [vmem:[#allocation8 + $0x70] sm:$0xff]  ;;  %s450_s7 = scalar_lea.vmem %s266_s6, 128  ;;  %p455_p2 = scmp.lt.s32.totalorder %s266_s6, %s266_s6 }
  0x29   :  { %377 = vmatprep.mubr.msk.f32.mxu1 %vm482_vm0, %v481_v0  ;;  %v181_v12 = vld [vmem:[#allocation8 + $0x78] sm:$0xff]  ;;  %v179_v14 = vld [vmem:[#allocation8 + $0x68] sm:$0xff]  ;;  %v75_v15 = vld [vmem:[#allocation6 + $0x30] sm:$0xff]  ;;  %p451_p1 = scmp.ne.s32.totalorder %s266_s6, %s450_s7  ;;  %p456_p3 = scmp.lt.s32.totalorder %s450_s7, %s450_s7 }
  0x2a   :  { %346 = vmatpush3.msra.mxu1 %v181_v12  ;;  %v178_v16 = vld [vmem:[#allocation8 + $0x60] sm:$0xff]  ;;  %v177_v17 = vld [vmem:[#allocation8 + $0x58] sm:$0xff]  ;;  %v74_v18 = vld [vmem:[#allocation6 + $0x28] sm:$0xff] }
  0x2b   :  { %313 = vmatpush3.xpose.msra.mxu0 %v83_v4  ;;  %347 = vmatprep.subr.mxu1 %v481_v0  ;;  %v176_v19 = vld [vmem:[#allocation8 + $0x50] sm:$0xff]  ;;  %v175_v20 = vld [vmem:[#allocation8 + $0x48] sm:$0xff]  ;;  %v73_v21 = vld [vmem:[#allocation6 + $0x20] sm:$0xff]  ;;  %p457_p4 = por %p456_p3, %p455_p2 }
  0x2c   :  { %314 = vmatprep.subr.mxu0 %v481_v0  ;;  %348 = vmatpush3.msra.mxu1 %v180_v13  ;;  %v174_v22 = vld [vmem:[#allocation8 + $0x40] sm:$0xff]  ;;  %v173_v23 = vld [vmem:[#allocation8 + $0x38] sm:$0xff]  ;;  %v172_v25 = vld [vmem:[#allocation8 + $0x30] sm:$0xff] }
  0x2d   :  { %349 = vmatprep.subr.mxu1 %v481_v0  ;;  %v72_v24 = vld [vmem:[#allocation6 + $0x18] sm:$0xff]  ;;  %v171_v26 = vld [vmem:[#allocation8 + $0x28] sm:$0xff]  ;;  %v71_v27 = vld [vmem:[#allocation6 + $0x10] sm:$0xff]  ;;  %p458_p5 = pnand %p457_p4, %p451_p1 }
  0x2e   :  { %350 = vmatpush3.msra.mxu1 %v179_v14  ;;  %v170_v28 = vld [vmem:[#allocation8 + $0x20] sm:$0xff]  ;;  %v70_v29 = vld [vmem:[#allocation6 + $0x8] sm:$0xff]  ;;  %v169_v35 = vld [vmem:[#allocation8 + $0x18] sm:$0xff] }
  0x2f   :  { %315 = vmatpush3.xpose.msra.mxu0 %v82_v5  ;;  %351 = vmatprep.subr.mxu1 %v481_v0  ;;  %v69_v30 = vld [vmem:[#allocation6] sm:$0xff]  ;;  %v168_v36 = vld [vmem:[#allocation8 + $0x10] sm:$0xff]  ;;  %v167_v37 = vld [vmem:[#allocation8 + $0x8] sm:$0xff] }
  0x30   :  { %316 = vmatprep.subr.mxu0 %v481_v0  ;;  %352 = vmatpush3.msra.mxu1 %v178_v16  ;;  %v166_v38 = vld [vmem:[#allocation8] sm:$0xff]  ;;  %v275_v39 = vld [vmem:[%s565_s2] ss:$0 sm:$0xff] }
  0x31   :  { %353 = vmatprep.subr.mxu1 %v481_v0 }
  0x32   :  { %354 = vmatpush3.msra.mxu1 %v177_v17 }
  0x33   :  { %317 = vmatpush3.xpose.msra.mxu0 %v81_v6  ;;  %355 = vmatprep.subr.mxu1 %v481_v0 }
  0x34   :  { %318 = vmatprep.subr.mxu0 %v481_v0  ;;  %356 = vmatpush3.msra.mxu1 %v176_v19 }
  0x35   :  { %357 = vmatprep.subr.mxu1 %v481_v0 }
  0x36   :  { %358 = vmatpush3.msra.mxu1 %v175_v20 }
  0x37   :  { %319 = vmatpush3.xpose.msra.mxu0 %v80_v7  ;;  %359 = vmatprep.subr.mxu1 %v481_v0 }
  0x38   :  { %320 = vmatprep.subr.mxu0 %v481_v0  ;;  %360 = vmatpush3.msra.mxu1 %v174_v22 }
  0x39   :  { %361 = vmatprep.subr.mxu1 %v481_v0 }
  0x3a   :  { %362 = vmatpush3.msra.mxu1 %v173_v23 }
  0x3b   :  { %321 = vmatpush3.xpose.msra.mxu0 %v79_v8  ;;  %363 = vmatprep.subr.mxu1 %v481_v0 }
  0x3c   :  { %322 = vmatprep.subr.mxu0 %v481_v0  ;;  %364 = vmatpush3.msra.mxu1 %v172_v25 }
  0x3d   :  { %365 = vmatprep.subr.mxu1 %v481_v0 }
  0x3e   :  { %366 = vmatpush3.msra.mxu1 %v171_v26 }
  0x3f   :  { %323 = vmatpush3.xpose.msra.mxu0 %v78_v9  ;;  %367 = vmatprep.subr.mxu1 %v481_v0 }
  0x40   :  { %324 = vmatprep.subr.mxu0 %v481_v0  ;;  %368 = vmatpush3.msra.mxu1 %v170_v28 }
  0x41   :  { %369 = vmatprep.subr.mxu1 %v481_v0 }
  0x42   :  { %370 = vmatpush3.msra.mxu1 %v169_v35 }
  0x43   :  { %325 = vmatpush3.xpose.msra.mxu0 %v77_v10  ;;  %371 = vmatprep.subr.mxu1 %v481_v0 }
  0x44   :  { %326 = vmatprep.subr.mxu0 %v481_v0  ;;  %372 = vmatpush3.msra.mxu1 %v168_v36 }
  0x45   :  { %373 = vmatprep.subr.mxu1 %v481_v0 }
  0x46   :  { %374 = vmatpush3.msra.mxu1 %v167_v37 }
  0x47   :  { %327 = vmatpush3.xpose.msra.mxu0 %v76_v11  ;;  %375 = vmatprep.subr.mxu1 %v481_v0 }
  0x48   :  { %328 = vmatprep.subr.mxu0 %v481_v0  ;;  %376 = vmatpush3.msra.mxu1 %v166_v38 }
  0x4b   :  { %329 = vmatpush3.xpose.msra.mxu0 %v75_v15 }
  0x4c   :  { %330 = vmatprep.subr.mxu0 %v481_v0 }
  0x4f   :  { %331 = vmatpush3.xpose.msra.mxu0 %v74_v18 }
  0x50   :  { %332 = vmatprep.subr.mxu0 %v481_v0 }
  0x53   :  { %333 = vmatpush3.xpose.msra.mxu0 %v73_v21 }
  0x54   :  { %334 = vmatprep.subr.mxu0 %v481_v0 }
  0x57   :  { %335 = vmatpush3.xpose.msra.mxu0 %v72_v24 }
  0x58   :  { %336 = vmatprep.subr.mxu0 %v481_v0 }
  0x5b   :  { %337 = vmatpush3.xpose.msra.mxu0 %v71_v27 }
  0x5c   :  { %338 = vmatprep.subr.mxu0 %v481_v0 }
  0x5f   :  { %339 = vmatpush3.xpose.msra.mxu0 %v70_v29 }
  0x60   :  { %340 = vmatprep.subr.mxu0 %v481_v0 }
  0x63   :  { %341 = vmatpush3.xpose.msra.mxu0 %v69_v30 }
  0xb1   :  { %v65_v31 = vpop.xlane.xlu0 %64 }
  0xb2   :  { %v66_v32 = vmax.f32 %v65_v31, 1e-24 }
  0xb4   :  { %388 = vrsqrt.f32 %v66_v32 }
  0xc1   :  { %v389_v33 = vpop.eup %388 }
  0xc2   :  { %v68_v34 = vmul.f32 %v389_v33, %v520_v1 }
  0xc4   :  { %343 = vmatmul.mubr.f32.vlgmr.msra.gmra.mxu0 %v68_v34 }
 0x184   :  { %v151_v40 = vpop.f32.mrf.mxu0 }
 0x185   :  { %v162_v41 = vmul.f32 %v275_v39, %v151_v40 }
 0x186   :  { %v344_v42 = vpop.f32.mrf.mxu0 }
 0x187   :  { %v163_v43 = vmul.f32 %v162_v41, %v162_v41 }
 0x189   :  { %v164_v44 = vmul.f32 %v163_v43, %v162_v41 }
 0x18b   :  { %378 = vmatmul.mubr.f32.vlgmr.msra.gmra.mxu1 %v164_v44 }
 0x24b   :  { %v248_v45 = vpop.f32.mrf.mxu1 }
 0x24c   :  { %258 = vst [vmem:[#allocation9] sm:$0xff] %v248_v45 }
 0x24d   :  { %v379_v46 = vpop.f32.mrf.mxu1 }
 0x24e   :  { %461 = shalt.err (!%p458_p5)
}
 0x24f   :  { %268 = dma.vmem_to_hbm [thread:$0]  %s266_s6, 128, %s567_s4, [#allocation5]  }
 0x250   :  { %474 = dma.done.wait [#allocation5], 128  }
 0x251   :  { %475 = vsyncadd [#allocation5], 4294967168 }
 0x252   :  { %272 = vsyncpa [#allocation4], 1 }
 0x253   :  { %273 = vsyncpa [#allocation7], 1 }
 0x254   :  { %274 = vsyncpa [#allocation5], 1 }

// kernel: tpu_custom_call.1
= control target key start
LH: loop header
LB: loop body
LE: loop exit
PB: predicated region body
PF: predicated region fallthrough
CT: control target
= control target key end

     0   :  { %9 = vsyncpa [#allocation4], 0  ;;  %s563_s0 = inlined_call_operand.hbm [shape: f32[8,128], index: 0, kind: input, shape index: {}]   ;;  %s564_s1 = inlined_call_operand.hbm [shape: f32[128,128], index: 1, kind: input, shape index: {}]   ;;  %s565_s2 = inlined_call_operand.vmem [shape: f32[1,128], index: 2, kind: input, shape index: {}]   ;;  %s566_s3 = inlined_call_operand.hbm [shape: f32[128,128], index: 3, kind: input, shape index: {}]   ;;  %s567_s4 = inlined_call_operand.hbm [shape: f32[8,128], index: 4, kind: output, shape index: {}]  }
   0x1   :  { %10 = vsyncpa [#allocation7], 0 }
   0x2   :  { %11 = vsyncpa [#allocation5], 0  ;;  %s476_s15 = smov [#allocation6]  }
   0x3   :  { %s27_s16 = sshll.u32 %s476_s15, 4  ;;  %s28_s16 = int_to_ptr.vmem [resolvable:$true] %s27_s16 }
   0x4   :  { %s398_s17 = scalar_lea.vmem %s28_s16, 2048  ;;  %p403_p1 = scmp.lt.s32.totalorder %s28_s16, %s28_s16 }
   0x5   :  { %p399_p0 = scmp.ne.s32.totalorder %s28_s16, %s398_s17  ;;  %p404_p2 = scmp.lt.s32.totalorder %s398_s17, %s398_s17 }
   0x7   :  { %p405_p3 = por %p404_p2, %p403_p1 }
   0x9   :  { %p406_p4 = pnand %p405_p3, %p399_p0 }
   0xb   :  { %409 = shalt.err (!%p406_p4)
}
   0xc   :  { %s477_s18 = smov 128   ;;  %s478_s19 = smov 8  }
   0xd   :  { %33 = dma.hbm_to_vmem [thread:$0]  %s564_s1, 2048, %s28_s16, [#allocation7], %s477_s18, %s477_s18, %s478_s19  }
   0xe   :  { %s479_s22 = smov [#allocation3]   ;;  %s480_s24 = smov [#allocation8]  }
   0xf   :  { %s18_s23 = sshll.u32 %s479_s22, 4  ;;  %s41_s25 = sshll.u32 %s480_s24, 4  ;;  %s19_s23 = int_to_ptr.vmem [resolvable:$true] %s18_s23  ;;  %s42_s25 = int_to_ptr.vmem [resolvable:$true] %s41_s25 }
  0x10   :  { %s418_s26 = scalar_lea.vmem %s19_s23, 128  ;;  %p423_p6 = scmp.lt.s32.totalorder %s19_s23, %s19_s23 }
  0x11   :  { %p419_p5 = scmp.ne.s32.totalorder %s19_s23, %s418_s26  ;;  %p424_p7 = scmp.lt.s32.totalorder %s418_s26, %s418_s26 }
  0x13   :  { %p425_p8 = por %p424_p7, %p423_p6 }
  0x15   :  { %p426_p9 = pnand %p425_p8, %p419_p5 }
  0x17   :  { %429 = shalt.err (!%p426_p9)
}
  0x18   :  { %21 = dma.hbm_to_vmem [thread:$0]  %s563_s0, 128, %s19_s23, [#allocation4]  }
  0x19   :  { %s438_s29 = scalar_lea.vmem %s42_s25, 2048  ;;  %p443_p11 = scmp.lt.s32.totalorder %s42_s25, %s42_s25 }
  0x1a   :  { %p439_p10 = scmp.ne.s32.totalorder %s42_s25, %s438_s29  ;;  %p444_p12 = scmp.lt.s32.totalorder %s438_s29, %s438_s29 }
  0x1c   :  { %p445_p13 = por %p444_p12, %p443_p11 }
  0x1e   :  { %p446_p0 = pnand %p445_p13, %p439_p10 }
  0x20   :  { %449 = shalt.err (!%p446_p0)
}
  0x21   :  { %47 = dma.hbm_to_vmem [thread:$0]  %s566_s3, 2048, %s42_s25, [#allocation7], %s477_s18, %s477_s18, %s478_s19  }
  0x22   :  { %470 = dma.done.wait [#allocation4], 128  }
  0x23   :  { %471 = vsyncadd [#allocation4], 4294967168 }
  0x24   :  { %472 = dma.done.wait [#allocation7], 4096  }
  0x25   :  { %473 = vsyncadd [#allocation7], 4294963200  ;;  %v481_v0 = vmov 0.0   ;;  %v520_v1 = vld [vmem:[#allocation3] sm:$0xff]  ;;  %v83_v4 = vld [vmem:[#allocation6 + $0x70] sm:$0xff]  ;;  %vm482_vm0 = vmmov 0  }
  0x26   :  { %310 = vmatprep.subr.mxu0 %v481_v0  ;;  %345 = vmatprep.subr.mxu1 %v481_v0  ;;  %v84_v2 = vld [vmem:[#allocation6 + $0x78] sm:$0xff]  ;;  %v63_v3 = vmul.f32 %v520_v1, %v520_v1  ;;  %v82_v5 = vld [vmem:[#allocation6 + $0x68] sm:$0xff]  ;;  %v81_v6 = vld [vmem:[#allocation6 + $0x60] sm:$0xff]  ;;  %s483_s5 = smov [#allocation9]  }
  0x27   :  { %311 = vmatpush3.xpose.msra.mxu0 %v84_v2  ;;  %v80_v7 = vld [vmem:[#allocation6 + $0x58] sm:$0xff]  ;;  %342 = vmatprep.mubr.msk.f32.mxu0 %vm482_vm0, %v481_v0  ;;  %v79_v8 = vld [vmem:[#allocation6 + $0x50] sm:$0xff]  ;;  %v78_v9 = vld [vmem:[#allocation6 + $0x48] sm:$0xff]  ;;  %s265_s6 = sshll.u32 %s483_s5, 4  ;;  %s266_s6 = int_to_ptr.vmem [resolvable:$true] %s265_s6 }
  0x28   :  { %312 = vmatprep.subr.mxu0 %v481_v0  ;;  %64 = vadd.xlane.f32.xlu0 %v63_v3  ;;  %v77_v10 = vld [vmem:[#allocation6 + $0x40] sm:$0xff]  ;;  %v76_v11 = vld [vmem:[#allocation6 + $0x38] sm:$0xff]  ;;  %v180_v13 = vld [vmem:[#allocation8 + $0x70] sm:$0xff]  ;;  %s450_s7 = scalar_lea.vmem %s266_s6, 128  ;;  %p455_p2 = scmp.lt.s32.totalorder %s266_s6, %s266_s6 }
  0x29   :  { %377 = vmatprep.mubr.msk.f32.mxu1 %vm482_vm0, %v481_v0  ;;  %v181_v12 = vld [vmem:[#allocation8 + $0x78] sm:$0xff]  ;;  %v179_v14 = vld [vmem:[#allocation8 + $0x68] sm:$0xff]  ;;  %v75_v15 = vld [vmem:[#allocation6 + $0x30] sm:$0xff]  ;;  %p451_p1 = scmp.ne.s32.totalorder %s266_s6, %s450_s7  ;;  %p456_p3 = scmp.lt.s32.totalorder %s450_s7, %s450_s7 }
  0x2a   :  { %346 = vmatpush3.msra.mxu1 %v181_v12  ;;  %v178_v16 = vld [vmem:[#allocation8 + $0x60] sm:$0xff]  ;;  %v177_v17 = vld [vmem:[#allocation8 + $0x58] sm:$0xff]  ;;  %v74_v18 = vld [vmem:[#allocation6 + $0x28] sm:$0xff] }
  0x2b   :  { %313 = vmatpush3.xpose.msra.mxu0 %v83_v4  ;;  %347 = vmatprep.subr.mxu1 %v481_v0  ;;  %v176_v19 = vld [vmem:[#allocation8 + $0x50] sm:$0xff]  ;;  %v175_v20 = vld [vmem:[#allocation8 + $0x48] sm:$0xff]  ;;  %v73_v21 = vld [vmem:[#allocation6 + $0x20] sm:$0xff]  ;;  %p457_p4 = por %p456_p3, %p455_p2 }
  0x2c   :  { %314 = vmatprep.subr.mxu0 %v481_v0  ;;  %348 = vmatpush3.msra.mxu1 %v180_v13  ;;  %v174_v22 = vld [vmem:[#allocation8 + $0x40] sm:$0xff]  ;;  %v173_v23 = vld [vmem:[#allocation8 + $0x38] sm:$0xff]  ;;  %v172_v25 = vld [vmem:[#allocation8 + $0x30] sm:$0xff] }
  0x2d   :  { %349 = vmatprep.subr.mxu1 %v481_v0  ;;  %v72_v24 = vld [vmem:[#allocation6 + $0x18] sm:$0xff]  ;;  %v171_v26 = vld [vmem:[#allocation8 + $0x28] sm:$0xff]  ;;  %v71_v27 = vld [vmem:[#allocation6 + $0x10] sm:$0xff]  ;;  %p458_p5 = pnand %p457_p4, %p451_p1 }
  0x2e   :  { %350 = vmatpush3.msra.mxu1 %v179_v14  ;;  %v170_v28 = vld [vmem:[#allocation8 + $0x20] sm:$0xff]  ;;  %v70_v29 = vld [vmem:[#allocation6 + $0x8] sm:$0xff]  ;;  %v169_v35 = vld [vmem:[#allocation8 + $0x18] sm:$0xff] }
  0x2f   :  { %315 = vmatpush3.xpose.msra.mxu0 %v82_v5  ;;  %351 = vmatprep.subr.mxu1 %v481_v0  ;;  %v69_v30 = vld [vmem:[#allocation6] sm:$0xff]  ;;  %v168_v36 = vld [vmem:[#allocation8 + $0x10] sm:$0xff]  ;;  %v167_v37 = vld [vmem:[#allocation8 + $0x8] sm:$0xff] }
  0x30   :  { %316 = vmatprep.subr.mxu0 %v481_v0  ;;  %352 = vmatpush3.msra.mxu1 %v178_v16  ;;  %v166_v38 = vld [vmem:[#allocation8] sm:$0xff]  ;;  %v275_v39 = vld [vmem:[%s565_s2] ss:$0 sm:$0xff] }
  0x31   :  { %353 = vmatprep.subr.mxu1 %v481_v0 }
  0x32   :  { %354 = vmatpush3.msra.mxu1 %v177_v17 }
  0x33   :  { %317 = vmatpush3.xpose.msra.mxu0 %v81_v6  ;;  %355 = vmatprep.subr.mxu1 %v481_v0 }
  0x34   :  { %318 = vmatprep.subr.mxu0 %v481_v0  ;;  %356 = vmatpush3.msra.mxu1 %v176_v19 }
  0x35   :  { %357 = vmatprep.subr.mxu1 %v481_v0 }
  0x36   :  { %358 = vmatpush3.msra.mxu1 %v175_v20 }
  0x37   :  { %319 = vmatpush3.xpose.msra.mxu0 %v80_v7  ;;  %359 = vmatprep.subr.mxu1 %v481_v0 }
  0x38   :  { %320 = vmatprep.subr.mxu0 %v481_v0  ;;  %360 = vmatpush3.msra.mxu1 %v174_v22 }
  0x39   :  { %361 = vmatprep.subr.mxu1 %v481_v0 }
  0x3a   :  { %362 = vmatpush3.msra.mxu1 %v173_v23 }
  0x3b   :  { %321 = vmatpush3.xpose.msra.mxu0 %v79_v8  ;;  %363 = vmatprep.subr.mxu1 %v481_v0 }
  0x3c   :  { %322 = vmatprep.subr.mxu0 %v481_v0  ;;  %364 = vmatpush3.msra.mxu1 %v172_v25 }
  0x3d   :  { %365 = vmatprep.subr.mxu1 %v481_v0 }
  0x3e   :  { %366 = vmatpush3.msra.mxu1 %v171_v26 }
  0x3f   :  { %323 = vmatpush3.xpose.msra.mxu0 %v78_v9  ;;  %367 = vmatprep.subr.mxu1 %v481_v0 }
  0x40   :  { %324 = vmatprep.subr.mxu0 %v481_v0  ;;  %368 = vmatpush3.msra.mxu1 %v170_v28 }
  0x41   :  { %369 = vmatprep.subr.mxu1 %v481_v0 }
  0x42   :  { %370 = vmatpush3.msra.mxu1 %v169_v35 }
  0x43   :  { %325 = vmatpush3.xpose.msra.mxu0 %v77_v10  ;;  %371 = vmatprep.subr.mxu1 %v481_v0 }
  0x44   :  { %326 = vmatprep.subr.mxu0 %v481_v0  ;;  %372 = vmatpush3.msra.mxu1 %v168_v36 }
  0x45   :  { %373 = vmatprep.subr.mxu1 %v481_v0 }
  0x46   :  { %374 = vmatpush3.msra.mxu1 %v167_v37 }
  0x47   :  { %327 = vmatpush3.xpose.msra.mxu0 %v76_v11  ;;  %375 = vmatprep.subr.mxu1 %v481_v0 }
  0x48   :  { %328 = vmatprep.subr.mxu0 %v481_v0  ;;  %376 = vmatpush3.msra.mxu1 %v166_v38 }
  0x4b   :  { %329 = vmatpush3.xpose.msra.mxu0 %v75_v15 }
  0x4c   :  { %330 = vmatprep.subr.mxu0 %v481_v0 }
  0x4f   :  { %331 = vmatpush3.xpose.msra.mxu0 %v74_v18 }
  0x50   :  { %332 = vmatprep.subr.mxu0 %v481_v0 }
  0x53   :  { %333 = vmatpush3.xpose.msra.mxu0 %v73_v21 }
  0x54   :  { %334 = vmatprep.subr.mxu0 %v481_v0 }
  0x57   :  { %335 = vmatpush3.xpose.msra.mxu0 %v72_v24 }
  0x58   :  { %336 = vmatprep.subr.mxu0 %v481_v0 }
  0x5b   :  { %337 = vmatpush3.xpose.msra.mxu0 %v71_v27 }
  0x5c   :  { %338 = vmatprep.subr.mxu0 %v481_v0 }
  0x5f   :  { %339 = vmatpush3.xpose.msra.mxu0 %v70_v29 }
  0x60   :  { %340 = vmatprep.subr.mxu0 %v481_v0 }
  0x63   :  { %341 = vmatpush3.xpose.msra.mxu0 %v69_v30 }
  0xb1   :  { %v65_v31 = vpop.xlane.xlu0 %64 }
  0xb2   :  { %v66_v32 = vmax.f32 %v65_v31, 1e-24 }
  0xb4   :  { %388 = vrsqrt.f32 %v66_v32 }
  0xc1   :  { %v389_v33 = vpop.eup %388 }
  0xc2   :  { %v68_v34 = vmul.f32 %v389_v33, %v520_v1 }
  0xc4   :  { %343 = vmatmul.mubr.f32.vlgmr.msra.gmra.mxu0 %v68_v34 }
 0x184   :  { %v151_v40 = vpop.f32.mrf.mxu0 }
 0x185   :  { %v162_v41 = vmul.f32 %v275_v39, %v151_v40 }
 0x186   :  { %v344_v42 = vpop.f32.mrf.mxu0 }
 0x187   :  { %v163_v43 = vmul.f32 %v162_v41, %v162_v41 }
 0x189   :  { %v164_v44 = vmul.f32 %v163_v43, %v162_v41 }
 0x18b   :  { %378 = vmatmul.mubr.f32.vlgmr.msra.gmra.mxu1 %v164_v44 }
 0x24b   :  { %v248_v45 = vpop.f32.mrf.mxu1 }
 0x24c   :  { %258 = vst [vmem:[#allocation9] sm:$0xff] %v248_v45 }
 0x24d   :  { %v379_v46 = vpop.f32.mrf.mxu1 }
 0x24e   :  { %461 = shalt.err (!%p458_p5)
}
 0x24f   :  { %268 = dma.vmem_to_hbm [thread:$0]  %s266_s6, 128, %s567_s4, [#allocation5]  }
 0x250   :  { %474 = dma.done.wait [#allocation5], 128  }
 0x251   :  { %475 = vsyncadd [#allocation5], 4294967168 }
 0x252   :  { %272 = vsyncpa [#allocation4], 1 }
 0x253   :  { %273 = vsyncpa [#allocation7], 1 }
 0x254   :  { %274 = vsyncpa [#allocation5], 1 }

</bundles_post_ra>
